<compile_context>
chip_gen: v7x
topology: tpu7x:2x2x1
jax: 0.10.0
libtpu: 0.0.40
codegen_flags: <defaults>
</compile_context>

<pallas_src>
import math

import jax
import jax.numpy as jnp
from jax.experimental import pallas as pl
from jax.experimental.pallas import tpu as pltpu

LANE = 128  # TPU lane width


def _mlp_kernel(x_ref, w1_ref, b1_ref, w23_ref, b23_ref, o_ref):
    # x: (TILE_B, in_size); w1: (in_size, HP); w23: (HP, LANE); biases: (1, *)
    x = x_ref[...]
    y1 = jnp.dot(x, w1_ref[...], preferred_element_type=jnp.float32) + b1_ref[...]
    y1 = jnp.maximum(y1, 0.0)                                           # ReLU
    y3 = jnp.dot(y1, w23_ref[...], preferred_element_type=jnp.float32) + b23_ref[...]
    # sigmoid(y) = 1 / (1 + exp(-y)); exp + approx reciprocal both go to the EUP.
    o_ref[...] = pl.reciprocal(1.0 + jnp.exp(-y3), approx=True)


def prepare_mlp_params(w1, b1, w2, b2, w3, b3):
    """Fold linear_2/linear_3 and zero-pad fan-out dims to 128 lanes.

    w1: (hidden, in), w2: (out, hidden), w3: (1, out)  -- PyTorch (out, in) layout.
    b1: (hidden,), b2: (out,), b3: (1,)
    Returns (w1p, b1p, w23p, b23p) ready for the kernel.
    """
    hidden = w1.shape[0]
    in_size = w1.shape[1]
    hp = ((hidden + LANE - 1) // LANE) * LANE

    w1_t = w1.T                                   # (in, hidden)
    w23 = w2.T @ w3.T                             # (hidden, 1)
    b23 = b2.reshape(1, -1) @ w3.T + b3.reshape(1, 1)  # (1, 1)

    w1p = jnp.zeros((in_size, hp), jnp.float32).at[:, :hidden].set(w1_t)
    b1p = jnp.zeros((1, hp), jnp.float32).at[0, :hidden].set(b1)
    w23p = jnp.zeros((hp, LANE), jnp.float32).at[:hidden, :1].set(w23)
    b23p = jnp.zeros((1, LANE), jnp.float32).at[:, :1].set(b23)
    return w1p, b1p, w23p, b23p


def mlp_forward(x, params):
    """x: (B, in_size) float32. Returns (B, 1) float32."""
    w1p, b1p, w23p, b23p = params
    B, in_size = x.shape
    hp = w1p.shape[1]

    # Batch tiling: small B -> single padded tile; large B -> 512-row tiles
    # (multiple of 8 sublanes, weights stay resident across grid steps).
    if B <= 512:
        tile_b = max(8, ((B + 7) // 8) * 8)
        b_pad = tile_b
    else:
        tile_b = 512
        b_pad = ((B + tile_b - 1) // tile_b) * tile_b
    if b_pad != B:
        x = jnp.pad(x, ((0, b_pad - B), (0, 0)))

    grid = (b_pad // tile_b,)
    const = lambda i: (0, 0)  # weights/biases: same block every step -> resident in VMEM

    out = pl.pallas_call(
        _mlp_kernel,
        out_shape=jax.ShapeDtypeStruct((b_pad, LANE), jnp.float32),
        grid=grid,
        in_specs=[
            pl.BlockSpec((tile_b, in_size), lambda i: (i, 0)),
            pl.BlockSpec((in_size, hp), const),
            pl.BlockSpec((1, hp), const),
            pl.BlockSpec((hp, LANE), const),
            pl.BlockSpec((1, LANE), const),
        ],
        out_specs=pl.BlockSpec((tile_b, LANE), lambda i: (i, 0)),
        compiler_params=pltpu.CompilerParams(dimension_semantics=("parallel",)),
    )(x, w1p, b1p, w23p, b23p)

    return out[:B, :1]


def xavier_uniform(key, out_features, in_features):
    # Matches torch.nn.init.xavier_uniform_ on a (out, in) Linear weight.
    bound = math.sqrt(6.0 / (in_features + out_features))
    return jax.random.uniform(
        key, (out_features, in_features), jnp.float32, minval=-bound, maxval=bound
    )


if __name__ == "__main__":
    in_size, hidden_size, output_size = 16, 32, 8
    batch = 8

    key = jax.random.PRNGKey(0)
    kx, k1, k2, k3 = jax.random.split(key, 4)

    x = jax.random.normal(kx, (batch, in_size), jnp.float32)

    # PyTorch Linear weights are (out, in); biases are zero-filled in __init__.
    w1 = xavier_uniform(k1, hidden_size, in_size)
    w2 = xavier_uniform(k2, output_size, hidden_size)
    w3 = xavier_uniform(k3, 1, output_size)
    b1 = jnp.zeros((hidden_size,), jnp.float32)
    b2 = jnp.zeros((output_size,), jnp.float32)
    b3 = jnp.zeros((1,), jnp.float32)

    params = prepare_mlp_params(w1, b1, w2, b2, w3, b3)
    out = mlp_forward(x, params)
    out = jax.block_until_ready(out)

    # Pure-JAX reference check (unfolded, unpadded).
    y1 = jnp.maximum(x @ w1.T + b1[None, :], 0.0)
    y2 = y1 @ w2.T + b2[None, :]
    y3 = y2 @ w3.T + b3[None, :]
    ref = jax.nn.sigmoid(y3)

    assert out.shape == (batch, 1)
    # approx=True reciprocal has ~1e-4 relative error; outputs are in (0,1).
    assert jnp.allclose(out, ref, atol=1e-3, rtol=1e-3), (out, ref)

    print("KERNEL_OK")
</pallas_src>

<mosaic_0001>
module attributes {stable_mosaic.version = 11 : i64} {
  func.func @_mlp_kernel(%arg0: i32, %arg1: memref<8x16xf32, #tpu.memory_space<vmem>>, %arg2: memref<16x128xf32, #tpu.memory_space<vmem>>, %arg3: memref<1x128xf32, #tpu.memory_space<vmem>>, %arg4: memref<128x128xf32, #tpu.memory_space<vmem>>, %arg5: memref<1x128xf32, #tpu.memory_space<vmem>>, %arg6: memref<8x128xf32, #tpu.memory_space<vmem>>) attributes {dimension_semantics = [#tpu.dimension_semantics<parallel>], iteration_bounds = array<i64: 1>, scalar_prefetch = 0 : i64, scratch_operands = 0 : i64, tpu.core_type = #tpu.core_type<tc>, window_params = [{transform_indices = @transform_0, window_bounds = array<i64: 8, 16>}, {pipeline_mode = #tpu.pipeline_mode<synchronous>, transform_indices = @transform_1, window_bounds = array<i64: 16, 128>}, {pipeline_mode = #tpu.pipeline_mode<synchronous>, transform_indices = @transform_2, window_bounds = array<i64: 1, 128>}, {pipeline_mode = #tpu.pipeline_mode<synchronous>, transform_indices = @transform_3, window_bounds = array<i64: 128, 128>}, {pipeline_mode = #tpu.pipeline_mode<synchronous>, transform_indices = @transform_4, window_bounds = array<i64: 1, 128>}, {transform_indices = @transform_5, window_bounds = array<i64: 8, 128>}]} {
    %c0 = arith.constant 0 : index
    %c0_0 = arith.constant 0 : index
    %0 = vector.load %arg1[%c0, %c0_0] : memref<8x16xf32, #tpu.memory_space<vmem>>, vector<8x16xf32>
    %c0_1 = arith.constant 0 : index
    %c0_2 = arith.constant 0 : index
    %1 = vector.load %arg2[%c0_1, %c0_2] : memref<16x128xf32, #tpu.memory_space<vmem>>, vector<16x128xf32>
    %cst = arith.constant dense<0.000000e+00> : vector<8x128xf32>
    %2 = tpu.matmul %0, %1, %cst {dimension_numbers = #tpu.dot_dimension_numbers<[1], [0], [0], [1], [0, 0, 1, 1], [], []>} : vector<8x16xf32>, vector<16x128xf32>, vector<8x128xf32> -> vector<8x128xf32>
    %c0_3 = arith.constant 0 : index
    %c0_4 = arith.constant 0 : index
    %3 = vector.load %arg3[%c0_3, %c0_4] : memref<1x128xf32, #tpu.memory_space<vmem>>, vector<1x128xf32>
    %4 = vector.broadcast %3 : vector<1x128xf32> to vector<8x128xf32>
    %5 = arith.addf %2, %4 : vector<8x128xf32>
    %cst_5 = arith.constant 0.000000e+00 : f32
    %6 = vector.broadcast %cst_5 : f32 to vector<8x128xf32>
    %7 = arith.maximumf %5, %6 : vector<8x128xf32>
    %c0_6 = arith.constant 0 : index
    %c0_7 = arith.constant 0 : index
    %8 = vector.load %arg4[%c0_6, %c0_7] : memref<128x128xf32, #tpu.memory_space<vmem>>, vector<128x128xf32>
    %cst_8 = arith.constant dense<0.000000e+00> : vector<8x128xf32>
    %9 = tpu.matmul %7, %8, %cst_8 {dimension_numbers = #tpu.dot_dimension_numbers<[1], [0], [0], [1], [0, 0, 1, 1], [], []>} : vector<8x128xf32>, vector<128x128xf32>, vector<8x128xf32> -> vector<8x128xf32>
    %c0_9 = arith.constant 0 : index
    %c0_10 = arith.constant 0 : index
    %10 = vector.load %arg5[%c0_9, %c0_10] : memref<1x128xf32, #tpu.memory_space<vmem>>, vector<1x128xf32>
    %11 = vector.broadcast %10 : vector<1x128xf32> to vector<8x128xf32>
    %12 = arith.addf %9, %11 : vector<8x128xf32>
    %cst_11 = arith.constant 0.000000e+00 : f32
    %13 = vector.broadcast %cst_11 : f32 to vector<8x128xf32>
    %14 = arith.subf %13, %12 : vector<8x128xf32>
    %15 = math.exp %14 : vector<8x128xf32>
    %cst_12 = arith.constant 1.000000e+00 : f32
    %16 = vector.broadcast %cst_12 : f32 to vector<8x128xf32>
    %17 = arith.addf %16, %15 : vector<8x128xf32>
    %18 = tpu.reciprocal %17 {approx = true} : vector<8x128xf32> -> vector<8x128xf32>
    %c0_13 = arith.constant 0 : index
    %c0_14 = arith.constant 0 : index
    %19 = vector.load %arg6[%c0_13, %c0_14] : memref<8x128xf32, #tpu.memory_space<vmem>>, vector<8x128xf32>
    tpu.vector_store %arg6[%c0_13, %c0_14], %18 {strides = array<i32>} : memref<8x128xf32, #tpu.memory_space<vmem>>, vector<8x128xf32>,
    return
  }
  func.func @transform_0(%arg0: i32) -> (i32, i32) {
    %c0_i32 = arith.constant 0 : i32
    %c0_i32_0 = arith.constant 0 : i32
    return %arg0, %c0_i32 : i32, i32
  }
  func.func @transform_1(%arg0: i32) -> (i32, i32) {
    %c0_i32 = arith.constant 0 : i32
    %c0_i32_0 = arith.constant 0 : i32
    %c0_i32_1 = arith.constant 0 : i32
    return %c0_i32, %c0_i32_0 : i32, i32
  }
  func.func @transform_2(%arg0: i32) -> (i32, i32) {
    %c0_i32 = arith.constant 0 : i32
    %c0_i32_0 = arith.constant 0 : i32
    %c0_i32_1 = arith.constant 0 : i32
    return %c0_i32, %c0_i32_0 : i32, i32
  }
  func.func @transform_3(%arg0: i32) -> (i32, i32) {
    %c0_i32 = arith.constant 0 : i32
    %c0_i32_0 = arith.constant 0 : i32
    %c0_i32_1 = arith.constant 0 : i32
    return %c0_i32, %c0_i32_0 : i32, i32
  }
  func.func @transform_4(%arg0: i32) -> (i32, i32) {
    %c0_i32 = arith.constant 0 : i32
    %c0_i32_0 = arith.constant 0 : i32
    %c0_i32_1 = arith.constant 0 : i32
    return %c0_i32, %c0_i32_0 : i32, i32
  }
  func.func @transform_5(%arg0: i32) -> (i32, i32) {
    %c0_i32 = arith.constant 0 : i32
    %c0_i32_0 = arith.constant 0 : i32
    return %arg0, %c0_i32 : i32, i32
  }
}

</mosaic_0001>

<bundles_post_ra>
// kernel: tpu_custom_call.1
= control target key start
LH: loop header
LB: loop body
LE: loop exit
PB: predicated region body
PF: predicated region fallthrough
CT: control target
= control target key end

     0   :  { %10 = vsyncpa [#allocation3], 0  ;;  %s558_s0 = inlined_call_operand.hbm [shape: f32[8,16], index: 0, kind: input, shape index: {}]   ;;  %s559_s1 = inlined_call_operand.hbm [shape: f32[16,128], index: 1, kind: input, shape index: {}]   ;;  %s560_s2 = inlined_call_operand.vmem [shape: f32[1,128], index: 2, kind: input, shape index: {}]   ;;  %s561_s3 = inlined_call_operand.hbm [shape: f32[128,128], index: 3, kind: input, shape index: {}]   ;;  %s562_s4 = inlined_call_operand.vmem [shape: f32[1,128], index: 4, kind: input, shape index: {}]   ;;  %s563_s5 = inlined_call_operand.hbm [shape: f32[8,128], index: 5, kind: output, shape index: {}]  }
   0x1   :  { %11 = vsyncpa [#allocation6], 0 }
   0x2   :  { %12 = vsyncpa [#allocation4], 0  ;;  %s459_s18 = smov [#allocation5]   ;;  %s365_s22 = scalar_lea.hbm %s559_s1, 256 }
   0x3   :  { %s28_s19 = sshll.u32 %s459_s18, 4  ;;  %p366_p0 = scmp.ne.s32.totalorder %s559_s1, %s365_s22  ;;  %s29_s19 = int_to_ptr.vmem [resolvable:$true] %s28_s19 }
   0x4   :  { %p369_p1 = scmp.lt.u32.totalorder %s365_s22, %s559_s1 }
   0x6   :  { %p371_p2 = pnand %p369_p1, %p366_p0 }
   0x8   :  { %374 = shalt.err (!%p371_p2)
}
   0x9   :  { %s375_s27 = scalar_lea.vmem %s29_s19, 256  ;;  %p380_p4 = scmp.lt.s32.totalorder %s29_s19, %s29_s19 }
   0xa   :  { %p376_p3 = scmp.ne.s32.totalorder %s29_s19, %s375_s27  ;;  %p381_p5 = scmp.lt.s32.totalorder %s375_s27, %s375_s27 }
   0xc   :  { %p382_p6 = por %p381_p5, %p380_p4 }
   0xe   :  { %p383_p7 = pnand %p382_p6, %p376_p3 }
  0x10   :  { %386 = shalt.err (!%p383_p7)
}
  0x11   :  { %s460_s28 = smov 128   ;;  %s461_s29 = smov 8  }
  0x12   :  { %34 = dma.hbm_to_vmem [thread:$0]  %s559_s1, 256, %s29_s19, [#allocation6], %s460_s28, %s460_s28, %s461_s29  }
  0x13   :  { %s462_s7 = smov [#allocation2]   ;;  %s463_s9 = smov [#allocation7]  }
  0x14   :  { %s19_s8 = sshll.u32 %s462_s7, 4  ;;  %s42_s10 = sshll.u32 %s463_s9, 4  ;;  %s20_s8 = int_to_ptr.vmem [resolvable:$true] %s19_s8  ;;  %s43_s10 = int_to_ptr.vmem [resolvable:$true] %s42_s10 }
  0x15   :  { %s387_s13 = scalar_lea.hbm %s558_s0, 128 }
  0x16   :  { %p388_p8 = scmp.ne.s32.totalorder %s558_s0, %s387_s13  ;;  %p391_p9 = scmp.lt.u32.totalorder %s387_s13, %s558_s0 }
  0x18   :  { %p393_p10 = pnand %p391_p9, %p388_p8 }
  0x1a   :  { %396 = shalt.err (!%p393_p10)
}
  0x1b   :  { %s397_s1 = scalar_lea.vmem %s20_s8, 128  ;;  %p402_p12 = scmp.lt.s32.totalorder %s20_s8, %s20_s8 }
  0x1c   :  { %p398_p11 = scmp.ne.s32.totalorder %s20_s8, %s397_s1  ;;  %p403_p13 = scmp.lt.s32.totalorder %s397_s1, %s397_s1 }
  0x1e   :  { %p404_p0 = por %p403_p13, %p402_p12 }
  0x20   :  { %p405_p1 = pnand %p404_p0, %p398_p11 }
  0x22   :  { %408 = shalt.err (!%p405_p1)
}
  0x23   :  { %22 = dma.hbm_to_vmem [thread:$0]  %s558_s0, 128, %s20_s8, [#allocation3]  }
  0x24   :  { %s409_s22 = scalar_lea.hbm %s561_s3, 2048 }
  0x25   :  { %p410_p2 = scmp.ne.s32.totalorder %s561_s3, %s409_s22  ;;  %p413_p3 = scmp.lt.u32.totalorder %s409_s22, %s561_s3 }
  0x27   :  { %p415_p4 = pnand %p413_p3, %p410_p2 }
  0x29   :  { %418 = shalt.err (!%p415_p4)
}
  0x2a   :  { %s419_s27 = scalar_lea.vmem %s43_s10, 2048  ;;  %p424_p6 = scmp.lt.s32.totalorder %s43_s10, %s43_s10 }
  0x2b   :  { %p420_p5 = scmp.ne.s32.totalorder %s43_s10, %s419_s27  ;;  %p425_p7 = scmp.lt.s32.totalorder %s419_s27, %s419_s27 }
  0x2d   :  { %p426_p8 = por %p425_p7, %p424_p6 }
  0x2f   :  { %p427_p9 = pnand %p426_p8, %p420_p5 }
  0x31   :  { %430 = shalt.err (!%p427_p9)
}
  0x32   :  { %48 = dma.hbm_to_vmem [thread:$0]  %s561_s3, 2048, %s43_s10, [#allocation6], %s460_s28, %s460_s28, %s461_s29  }
  0x33   :  { %453 = dma.done.wait [#allocation3], 128  }
  0x34   :  { %454 = vsyncadd [#allocation3], 4294967168 }
  0x35   :  { %455 = dma.done.wait [#allocation6], 2304  }
  0x36   :  { %456 = vsyncadd [#allocation6], 4294964992  ;;  %v464_v0 = vmov 0.0|0.0   ;;  %vm465_vm0 = vmmov 0   ;;  %v466_v1 = vmov 0.0   ;;  %v61_v2 = vld [vmem:[#allocation5] sm:$0xff] }
  0x37   :  { %325 = vmatprep.subr.bf16.mxu0 %v464_v0  ;;  %287 = vmatprep.mubr.msk.f32.mxu0 %vm465_vm0, %v466_v1  ;;  %v62_v3 = vld [vmem:[#allocation5 + $0x8] sm:$0xff]  ;;  %v145_v5 = vld [vmem:[#allocation7] sm:$0xff]  ;;  %v146_v6 = vld [vmem:[#allocation7 + $0x8] sm:$0xff]  ;;  %vm70_vm1 = vcmask 130048   ;;  %s467_s7 = smov [#allocation8]  }
  0x38   :  { %328 = vmatprep.subr.bf16.mxu1 %v464_v0  ;;  %322 = vmatprep.mubr.msk.f32.mxu1 %vm465_vm0, %v466_v1  ;;  %v326_v4 = vpack.c.bf16 %v62_v3, %v61_v2  ;;  %v147_v7 = vld [vmem:[#allocation7 + $0x10] sm:$0xff]  ;;  %v329_v8 = vpack.c.bf16 %v146_v6, %v145_v5  ;;  %v148_v9 = vld [vmem:[#allocation7 + $0x18] sm:$0xff]  ;;  %v60_v10 = vld [vmem:[#allocation2] sm:$0xff] }
  0x39   :  { %v332_v11 = vpack.c.bf16 %v148_v9, %v147_v7  ;;  %v149_v12 = vld [vmem:[#allocation7 + $0x20] sm:$0xff]  ;;  %v150_v13 = vld [vmem:[#allocation7 + $0x28] sm:$0xff]  ;;  %v151_v15 = vld [vmem:[#allocation7 + $0x30] sm:$0xff] }
  0x3a   :  { %327 = vmatpush3.bf16.msra.mxu0 %v326_v4  ;;  %330 = vmatpush3.bf16.msra.mxu1 %v329_v8  ;;  %v335_v14 = vpack.c.bf16 %v150_v13, %v149_v12  ;;  %v152_v16 = vld [vmem:[#allocation7 + $0x38] sm:$0xff]  ;;  %v153_v18 = vld [vmem:[#allocation7 + $0x40] sm:$0xff]  ;;  %v154_v19 = vld [vmem:[#allocation7 + $0x48] sm:$0xff] }
  0x3b   :  { %331 = vmatprep.subr.bf16.mxu1 %v464_v0  ;;  %v338_v17 = vpack.c.bf16 %v152_v16, %v151_v15  ;;  %v341_v20 = vpack.c.bf16 %v154_v19, %v153_v18  ;;  %v155_v21 = vld [vmem:[#allocation7 + $0x50] sm:$0xff]  ;;  %v156_v22 = vld [vmem:[#allocation7 + $0x58] sm:$0xff]  ;;  %v157_v24 = vld [vmem:[#allocation7 + $0x60] sm:$0xff] }
  0x3c   :  { %v344_v23 = vpack.c.bf16 %v156_v22, %v155_v21  ;;  %v158_v25 = vld [vmem:[#allocation7 + $0x68] sm:$0xff]  ;;  %v159_v27 = vld [vmem:[#allocation7 + $0x70] sm:$0xff]  ;;  %v160_v28 = vld [vmem:[#allocation7 + $0x78] sm:$0xff] }
  0x3d   :  { %288 = vmatmul.mubr.msk.f32.vlgmr.msra.gmra.mrb[0].mxu0 %vm70_vm1, %v60_v10  ;;  %v347_v26 = vpack.c.bf16 %v158_v25, %v157_v24  ;;  %v350_v29 = vpack.c.bf16 %v160_v28, %v159_v27  ;;  %v260_v30 = vld [vmem:[%s560_s2] ss:$0 sm:$0xff]  ;;  %s250_s2 = sshll.u32 %s467_s7, 4  ;;  %s251_s2 = int_to_ptr.vmem [resolvable:$true] %s250_s2 }
  0x3e   :  { %333 = vmatpush3.bf16.msra.mxu1 %v332_v11  ;;  %v262_v35 = vld [vmem:[%s562_s4] ss:$0 sm:$0xff]  ;;  %s431_s8 = scalar_lea.vmem %s251_s2, 128  ;;  %p436_p11 = scmp.lt.s32.totalorder %s251_s2, %s251_s2 }
  0x3f   :  { %334 = vmatprep.subr.bf16.mxu1 %v464_v0  ;;  %p432_p10 = scmp.ne.s32.totalorder %s251_s2, %s431_s8  ;;  %p437_p12 = scmp.lt.s32.totalorder %s431_s8, %s431_s8 }
  0x41   :  { %p438_p13 = por %p437_p12, %p436_p11 }
  0x42   :  { %336 = vmatpush3.bf16.msra.mxu1 %v335_v14 }
  0x43   :  { %337 = vmatprep.subr.bf16.mxu1 %v464_v0  ;;  %p439_p0 = pnand %p438_p13, %p432_p10 }
  0x46   :  { %339 = vmatpush3.bf16.msra.mxu1 %v338_v17 }
  0x47   :  { %340 = vmatprep.subr.bf16.mxu1 %v464_v0 }
  0x4a   :  { %342 = vmatpush3.bf16.msra.mxu1 %v341_v20 }
  0x4b   :  { %343 = vmatprep.subr.bf16.mxu1 %v464_v0 }
  0x4e   :  { %345 = vmatpush3.bf16.msra.mxu1 %v344_v23 }
  0x4f   :  { %346 = vmatprep.subr.bf16.mxu1 %v464_v0 }
  0x52   :  { %348 = vmatpush3.bf16.msra.mxu1 %v347_v26 }
  0x53   :  { %349 = vmatprep.subr.bf16.mxu1 %v464_v0 }
  0x56   :  { %351 = vmatpush3.bf16.msra.mxu1 %v350_v29 }
 0x110   :  { %v140_v31 = vpop.f32.mrb[0].mxu0 }
 0x111   :  { %v141_v32 = vadd.f32 %v260_v30, %v140_v31  ;;  %v289_v33 = vpop.f32.mrb[1].mxu0 }
 0x113   :  { %v144_v34 = vmax.f32 %v141_v32, 0.0 }
 0x115   :  { %323 = vmatmul.mubr.f32.vlgmr.msra.gmra.mrb[0].mxu1 %v144_v34 }
 0x1e8   :  { %v234_v36 = vpop.f32.mrb[0].mxu1 }
 0x1e9   :  { %v235_v37 = vadd.f32 %v262_v35, %v234_v36  ;;  %v324_v38 = vpop.f32.mrb[1].mxu1 }
 0x1eb   :  { %v238_v39 = vsub.f32 0.0, %v235_v37 }
 0x1ed   :  { %v239_v40 = vmul.f32 1.442695, %v238_v39 }
 0x1ef   :  { %361 = vpow2.f32 %v239_v40 }
 0x1f9   :  { %v362_v41 = vpop.eup %361 }
 0x1fa   :  { %v241_v42 = vadd.f32 1.0, %v362_v41 }
 0x1fc   :  { %363 = vrcp.f32 %v241_v42 }
 0x206   :  { %v364_v43 = vpop.eup %363 }
 0x207   :  { %243 = vst [vmem:[#allocation8] sm:$0xff] %v364_v43 }
 0x208   :  { %442 = shalt.err (!%p439_p0)
}
 0x209   :  { %s443_s10 = scalar_lea.hbm %s563_s5, 128 }
 0x20a   :  { %p444_p1 = scmp.ne.s32.totalorder %s563_s5, %s443_s10  ;;  %p447_p2 = scmp.lt.u32.totalorder %s443_s10, %s563_s5 }
 0x20c   :  { %p449_p3 = pnand %p447_p2, %p444_p1 }
 0x20e   :  { %452 = shalt.err (!%p449_p3)
}
 0x20f   :  { %253 = dma.vmem_to_hbm [thread:$0]  %s251_s2, 128, %s563_s5, [#allocation4]  }
 0x210   :  { %457 = dma.done.wait [#allocation4], 128  }
 0x211   :  { %458 = vsyncadd [#allocation4], 4294967168 }
 0x212   :  { %257 = vsyncpa [#allocation3], 1 }
 0x213   :  { %258 = vsyncpa [#allocation6], 1 }
 0x214   :  { %259 = vsyncpa [#allocation4], 1 }

</bundles_post_ra>
